<compile_context>
chip_gen: v6e
topology: v6e:2x2x1
jax: 0.10.0
libtpu: 0.0.40
codegen_flags: <defaults>
</compile_context>

<pallas_src>
import functools

import numpy as np
import jax
import jax.numpy as jnp
from jax import lax
from jax.experimental import pallas as pl
from jax.experimental.pallas import tpu as pltpu


# ----------------------- host-side interpolation tables ---------------------

def _linear_interp_matrix(in_size: int, out_size: int) -> np.ndarray:
    """(out_size, in_size) 1-D linear interpolation matrix matching
    torch.nn.functional.interpolate(mode='trilinear', align_corners=False)."""
    out_idx = np.arange(out_size, dtype=np.float64)
    scale = in_size / out_size
    src = np.maximum((out_idx + 0.5) * scale - 0.5, 0.0)
    i0 = np.minimum(np.floor(src).astype(np.int64), in_size - 1)
    i1 = np.minimum(i0 + 1, in_size - 1)
    lam = src - i0
    w = np.zeros((out_size, in_size), dtype=np.float32)
    np.add.at(w, (np.arange(out_size), i0), (1.0 - lam).astype(np.float32))
    np.add.at(w, (np.arange(out_size), i1), lam.astype(np.float32))
    return w


def _interp_index_tables(in_size: int, out_size: int):
    """Lower source index i0(o) (int32) and fraction lambda(o) (f32) for
    half-pixel (align_corners=False) 1-D linear interpolation."""
    out_idx = np.arange(out_size, dtype=np.float64)
    scale = in_size / out_size
    src = np.maximum((out_idx + 0.5) * scale - 0.5, 0.0)
    i0 = np.minimum(np.floor(src).astype(np.int64), in_size - 1)
    lam = (src - i0).astype(np.float32)
    return i0.astype(np.int32), lam


# ------------------------------ fused kernel --------------------------------

def _fused_upsample_gap_kernel(idx0_ref, lam_ref, x_ref, wh_ref, wwt_ref,
                               y_ref, gap_ref, t2_ref,
                               *, d_in: int, tdo: int, unroll_fill: bool):
    """Grid = (N*C, Do//TDo).
    Refs: idx0 (SMEM, Do int32), lam (SMEM, Do f32),
          x (D,H,W) f32, Wh (Ho,H) f32, Ww^T (W,Wo) f32,
          y (TDo,Ho,Wo) bf16 out, gap (1,1,1) f32 out (spatial sum),
          t2 (D,Ho,Wo) f32 VMEM scratch (H/W-interpolated volume)."""
    j = pl.program_id(1)

    # Phase 1: once per (n, c) — H/W interpolation into the VMEM scratch,
    # plus GAP accumulator init.
    @pl.when(j == 0)
    def _():
        gap_ref[...] = jnp.zeros_like(gap_ref)
        wh = wh_ref[...]        # (Ho, H)
        wwt = wwt_ref[...]      # (W,  Wo)

        def fill_one_slab(d, carry):
            a = jnp.dot(x_ref[d], wwt, preferred_element_type=jnp.float32)   # (H, Wo)
            t2_ref[d] = jnp.dot(wh, a, preferred_element_type=jnp.float32)   # (Ho, Wo)
            return carry

        lax.fori_loop(0, d_in, fill_one_slab, 0, unroll=unroll_fill)

    # Phase 2: every step — D interpolation of TDo output slabs as a VPU
    # gather + lerp from the scratch, cast to bf16 on store, while
    # accumulating the spatial sum for the fused global-average-pool.
    def emit_one_slab(t, acc):
        do = j * tdo + t
        i0 = idx0_ref[do]                                   # SMEM scalar reads
        i1 = jnp.minimum(i0 + 1, d_in - 1)
        lam = lam_ref[do]
        lo = t2_ref[i0]                                     # (Ho, Wo) f32
        hi = t2_ref[i1]
        row = lo + lam * (hi - lo)
        y_ref[t] = row.astype(y_ref.dtype)
        return acc + jnp.sum(row)

    total = lax.fori_loop(0, tdo, emit_one_slab, jnp.float32(0.0))
    gap_ref[...] += total


# --------------------------- VMEM budgeting helpers --------------------------

def _pad(v: int, m: int) -> int:
    return -(-v // m) * m


def _buf_bytes(shape, dtype) -> int:
    item = np.dtype(dtype).itemsize
    shape = tuple(int(s) for s in shape)
    if len(shape) < 2:
        return _pad(int(np.prod(shape, dtype=np.int64)) * item, 512)
    sub = 8 * max(1, 4 // item)                     # 8 sublanes f32, 16 bf16
    lead = int(np.prod(shape[:-2], dtype=np.int64)) if len(shape) > 2 else 1
    return lead * _pad(shape[-2], sub) * _pad(shape[-1], 128) * item


def _working_set_bytes(tdo, d_in, h_in, w_in, ho, wo) -> int:
    b = 0
    b += 2 * _buf_bytes((d_in, h_in, w_in), jnp.float32)    # x block (double-buffered)
    b += _buf_bytes((ho, h_in), jnp.float32)                # Wh
    b += _buf_bytes((w_in, wo), jnp.float32)                # Ww^T
    b += 2 * _buf_bytes((tdo, ho, wo), jnp.bfloat16)        # y block (double-buffered)
    b += 2 * _buf_bytes((1, 1, 1), jnp.float32)             # gap block
    b += _buf_bytes((d_in, ho, wo), jnp.float32)            # t2 scratch
    return b


def _pick_do_tile(do, d_in, h_in, w_in, ho, wo, budget=20 * 2**20) -> int:
    for cand in (do, 128, 64, 32, 16, 8, 4, 2, 1):
        if cand <= do and do % cand == 0:
            if _working_set_bytes(cand, d_in, h_in, w_in, ho, wo) <= budget:
                return cand
    return 1


# --------------------- fused trilinear upsample + GAP ------------------------

def trilinear_upsample_with_gap(x: jax.Array, size):
    """x: (N, C, D, H, W) -> (y, gap)
    y:   (N, C, *size) bf16, == nnf.interpolate(x, size, mode='trilinear')
    gap: (N, C) f32,        == y's f32 values averaged over spatial dims."""
    n, c, d_in, h_in, w_in = (int(s) for s in x.shape)
    do, ho, wo = (int(s) for s in size)
    nc = n * c

    x2 = x.reshape(nc, d_in, h_in, w_in).astype(jnp.float32)
    wh = jnp.asarray(_linear_interp_matrix(h_in, ho))          # (Ho, H)
    wwt = jnp.asarray(_linear_interp_matrix(w_in, wo).T)       # (W,  Wo)
    idx0_np, lam_np = _interp_index_tables(d_in, do)
    idx0 = jnp.asarray(idx0_np)                                # (Do,) int32
    lam = jnp.asarray(lam_np)                                  # (Do,) f32

    tdo = _pick_do_tile(do, d_in, h_in, w_in, ho, wo)
    ws = _working_set_bytes(tdo, d_in, h_in, w_in, ho, wo)
    vmem_limit = int(min(max(ws + (8 << 20), 32 << 20), 64 << 20))

    kernel = functools.partial(
        _fused_upsample_gap_kernel, d_in=d_in, tdo=tdo,
        unroll_fill=(d_in <= 32))

    y, gap = pl.pallas_call(
        kernel,
        out_shape=(
            jax.ShapeDtypeStruct((nc, do, ho, wo), jnp.bfloat16),
            jax.ShapeDtypeStruct((nc, 1, 1), jnp.float32),
        ),
        grid_spec=pltpu.PrefetchScalarGridSpec(
            num_scalar_prefetch=2,
            grid=(nc, do // tdo),
            in_specs=[
                pl.BlockSpec((None, d_in, h_in, w_in),
                             lambda i, j, idx, lm: (i, 0, 0, 0)),
                pl.BlockSpec((ho, h_in), lambda i, j, idx, lm: (0, 0)),
                pl.BlockSpec((w_in, wo), lambda i, j, idx, lm: (0, 0)),
            ],
            out_specs=[
                pl.BlockSpec((None, tdo, ho, wo),
                             lambda i, j, idx, lm: (i, j, 0, 0)),
                pl.BlockSpec((1, 1, 1), lambda i, j, idx, lm: (i, 0, 0)),
            ],
            scratch_shapes=[pltpu.VMEM((d_in, ho, wo), jnp.float32)],
        ),
        compiler_params=pltpu.CompilerParams(
            dimension_semantics=("parallel", "arbitrary"),
            vmem_limit_bytes=vmem_limit,
        ),
    )(idx0, lam, x2, wh, wwt)

    y = y.reshape(n, c, do, ho, wo)
    gap_mean = gap.reshape(n, c) / float(do * ho * wo)
    return y, gap_mean


# ------------------------------ encoder stub ---------------------------------

class StubEncoder:
    """Deterministic stand-in for the externally injected PUMIT ViT encoder."""
    # TODO(synk): the real `encoder` is a pretrained PUMIT ViT passed into
    # PUMITClassifier.__init__ (not defined in the reference file); it is
    # replaced here by a GAP + linear token stub.  A real ViT would consume the
    # full upsampled volume `x_up`; the stub only needs the fused GAP.

    def __init__(self, in_channels: int, dim: int, key):
        k1, k2 = jax.random.split(key)
        self.w = jax.random.normal(k1, (in_channels, dim), jnp.float32) * 0.02
        self.b = jax.random.normal(k2, (dim,), jnp.float32) * 0.02

    def __call__(self, x_up: jax.Array, gap: jax.Array) -> jax.Array:
        # gap == x_up mean over spatial dims, accumulated in f32 inside the
        # fused Pallas kernel (avoids re-reading the upsampled volume).
        tok = gap.astype(jnp.float32) @ self.w + self.b    # tiny matmul -> plain XLA
        return tok[:, None, :]                             # (N, 1, dim); token 0 = cls


# ------------------------------- classifier ----------------------------------

class PUMITClassifierPallas:
    def __init__(self, encoder, dim: int, n_classes: int, key,
                 target_size=(160, 160, 160)):
        self.encoder = encoder
        self.target_size = target_size
        k1, k2 = jax.random.split(key)
        # nn.Linear(dim, n_classes): weight (n_classes, dim), bias (n_classes,)
        bound = 1.0 / np.sqrt(dim)
        self.fc_weight = jax.random.uniform(k1, (n_classes, dim), jnp.float32,
                                            -bound, bound)
        self.fc_bias = jax.random.uniform(k2, (n_classes,), jnp.float32,
                                          -bound, bound)

    def __call__(self, x: jax.Array) -> jax.Array:
        # nnf.interpolate(..., mode='trilinear') fused with the stub encoder's
        # global pooling; the upsampled volume is written once (bf16).
        x_up, gap = trilinear_upsample_with_gap(x, self.target_size)
        # SpatialTensor(x, 0) only attaches a downsample-level tag; identity.
        cls_token = self.encoder(x_up, gap)[:, 0, :]             # (N, dim)
        logits = cls_token @ self.fc_weight.T + self.fc_bias     # tiny head -> XLA
        return logits


# ---------------------------------- main --------------------------------------

if __name__ == "__main__":
    key = jax.random.PRNGKey(0)
    k_x, k_enc, k_head = jax.random.split(key, 3)

    batch, channels, spatial = 2, 3, 8
    dim, n_classes = 32, 4
    # Real module upsamples to (160, 160, 160); use a small target for the test.
    target = (16, 16, 16)

    x = jax.random.normal(k_x, (batch, channels, spatial, spatial, spatial),
                          jnp.float32)

    # Sanity check of the fused kernel against a pure-XLA separable reference.
    y, gap = trilinear_upsample_with_gap(x, target)
    jax.block_until_ready((y, gap))

    hi = jax.lax.Precision.HIGHEST
    wd_f = jnp.asarray(_linear_interp_matrix(spatial, target[0]))
    wh_f = jnp.asarray(_linear_interp_matrix(spatial, target[1]))
    ww_f = jnp.asarray(_linear_interp_matrix(spatial, target[2]))
    ref = jnp.einsum('od,ncdhw->ncohw', wd_f, x, precision=hi)
    ref = jnp.einsum('ph,ncohw->ncopw', wh_f, ref, precision=hi)
    ref = jnp.einsum('qw,ncopw->ncopq', ww_f, ref, precision=hi)
    np.testing.assert_allclose(np.asarray(y.astype(jnp.float32)), np.asarray(ref),
                               rtol=5e-2, atol=5e-2)
    np.testing.assert_allclose(np.asarray(gap),
                               np.asarray(ref.mean(axis=(2, 3, 4))),
                               rtol=1e-3, atol=1e-3)

    encoder = StubEncoder(channels, dim, k_enc)
    model = PUMITClassifierPallas(encoder, dim, n_classes, k_head,
                                  target_size=target)
    logits = model(x)
    jax.block_until_ready(logits)
    assert logits.shape == (batch, n_classes)
    print("KERNEL_OK")
</pallas_src>

<mosaic_0001>
module attributes {stable_mosaic.version = 11 : i64} {
  func.func @_fused_upsample_gap_kernel(%arg0: i32, %arg1: i32, %arg2: memref<16xi32, #tpu.memory_space<smem>>, %arg3: memref<16xf32, #tpu.memory_space<smem>>, %arg4: memref<1x8x8x8xf32, #tpu.memory_space<vmem>>, %arg5: memref<16x8xf32, #tpu.memory_space<vmem>>, %arg6: memref<8x16xf32, #tpu.memory_space<vmem>>, %arg7: memref<1x16x16x16xbf16, #tpu.memory_space<vmem>>, %arg8: memref<1x1x1xf32, #tpu.memory_space<vmem>>, %arg9: memref<8x16x16xf32, #tpu.memory_space<vmem>>) attributes {dimension_semantics = [#tpu.dimension_semantics<parallel>, #tpu.dimension_semantics<arbitrary>], iteration_bounds = array<i64: 6, 1>, scalar_prefetch = 2 : i64, scratch_operands = 1 : i64, tpu.core_type = #tpu.core_type<tc>, window_params = [{transform_indices = @transform_0, window_bounds = array<i64: 1, 8, 8, 8>}, {pipeline_mode = #tpu.pipeline_mode<synchronous>, transform_indices = @transform_1, window_bounds = array<i64: 16, 8>}, {pipeline_mode = #tpu.pipeline_mode<synchronous>, transform_indices = @transform_2, window_bounds = array<i64: 8, 16>}, {transform_indices = @transform_3, window_bounds = array<i64: 1, 16, 16, 16>}, {transform_indices = @transform_4, window_bounds = array<i64: 1, 1, 1>}]} {
    %c0_i32 = arith.constant 0 : i32
    %0 = arith.cmpi eq, %arg1, %c0_i32 : i32
    %1 = arith.extui %0 : i1 to i32
    %c0_i32_0 = arith.constant 0 : i32
    %2 = arith.cmpi ne, %1, %c0_i32_0 : i32
    scf.if %2 {
      %cst_8 = arith.constant 0.000000e+00 : f32
      %9 = vector.broadcast %cst_8 : f32 to vector<1x1x1xf32>
      %c0_9 = arith.constant 0 : index
      %c0_10 = arith.constant 0 : index
      %c0_11 = arith.constant 0 : index
      %10 = vector.load %arg8[%c0_9, %c0_10, %c0_11] : memref<1x1x1xf32, #tpu.memory_space<vmem>>, vector<1x1x1xf32>
      tpu.vector_store %arg8[%c0_9, %c0_10, %c0_11], %9 {strides = array<i32>} : memref<1x1x1xf32, #tpu.memory_space<vmem>>, vector<1x1x1xf32>,
      %c0_12 = arith.constant 0 : index
      %c0_13 = arith.constant 0 : index
      %11 = vector.load %arg5[%c0_12, %c0_13] : memref<16x8xf32, #tpu.memory_space<vmem>>, vector<16x8xf32>
      %c0_14 = arith.constant 0 : index
      %c0_15 = arith.constant 0 : index
      %12 = vector.load %arg6[%c0_14, %c0_15] : memref<8x16xf32, #tpu.memory_space<vmem>>, vector<8x16xf32>
      %c0_i32_16 = arith.constant 0 : i32
      %c0_17 = arith.constant 0 : index
      %13 = arith.index_cast %c0_i32_16 : i32 to index
      %c0_18 = arith.constant 0 : index
      %c0_19 = arith.constant 0 : index
      %14 = vector.load %arg4[%c0_17, %13, %c0_18, %c0_19] : memref<1x8x8x8xf32, #tpu.memory_space<vmem>>, vector<1x1x8x8xf32>
      %15 = vector.shape_cast %14 : vector<1x1x8x8xf32> to vector<8x8xf32>
      %cst_20 = arith.constant dense<0.000000e+00> : vector<8x16xf32>
      %16 = tpu.matmul %15, %12, %cst_20 {dimension_numbers = #tpu.dot_dimension_numbers<[1], [0], [0], [1], [0, 0, 1, 1], [], []>} : vector<8x8xf32>, vector<8x16xf32>, vector<8x16xf32> -> vector<8x16xf32>
      %cst_21 = arith.constant dense<0.000000e+00> : vector<16x16xf32>
      %17 = tpu.matmul %11, %16, %cst_21 {dimension_numbers = #tpu.dot_dimension_numbers<[1], [0], [0], [1], [0, 0, 1, 1], [], []>} : vector<16x8xf32>, vector<8x16xf32>, vector<16x16xf32> -> vector<16x16xf32>
      %18 = arith.index_cast %c0_i32_16 : i32 to index
      %c0_22 = arith.constant 0 : index
      %c0_23 = arith.constant 0 : index
      %19 = vector.load %arg9[%18, %c0_22, %c0_23] : memref<8x16x16xf32, #tpu.memory_space<vmem>>, vector<1x16x16xf32>
      %20 = vector.shape_cast %19 : vector<1x16x16xf32> to vector<16x16xf32>
      %21 = vector.shape_cast %17 : vector<16x16xf32> to vector<1x16x16xf32>
      tpu.vector_store %arg9[%18, %c0_22, %c0_23], %21 {strides = array<i32>} : memref<8x16x16xf32, #tpu.memory_space<vmem>>, vector<1x16x16xf32>,
      %c1_i32_24 = arith.constant 1 : i32
      %c0_25 = arith.constant 0 : index
      %22 = arith.index_cast %c1_i32_24 : i32 to index
      %c0_26 = arith.constant 0 : index
      %c0_27 = arith.constant 0 : index
      %23 = vector.load %arg4[%c0_25, %22, %c0_26, %c0_27] : memref<1x8x8x8xf32, #tpu.memory_space<vmem>>, vector<1x1x8x8xf32>
      %24 = vector.shape_cast %23 : vector<1x1x8x8xf32> to vector<8x8xf32>
      %cst_28 = arith.constant dense<0.000000e+00> : vector<8x16xf32>
      %25 = tpu.matmul %24, %12, %cst_28 {dimension_numbers = #tpu.dot_dimension_numbers<[1], [0], [0], [1], [0, 0, 1, 1], [], []>} : vector<8x8xf32>, vector<8x16xf32>, vector<8x16xf32> -> vector<8x16xf32>
      %cst_29 = arith.constant dense<0.000000e+00> : vector<16x16xf32>
      %26 = tpu.matmul %11, %25, %cst_29 {dimension_numbers = #tpu.dot_dimension_numbers<[1], [0], [0], [1], [0, 0, 1, 1], [], []>} : vector<16x8xf32>, vector<8x16xf32>, vector<16x16xf32> -> vector<16x16xf32>
      %27 = arith.index_cast %c1_i32_24 : i32 to index
      %c0_30 = arith.constant 0 : index
      %c0_31 = arith.constant 0 : index
      %28 = vector.load %arg9[%27, %c0_30, %c0_31] : memref<8x16x16xf32, #tpu.memory_space<vmem>>, vector<1x16x16xf32>
      %29 = vector.shape_cast %28 : vector<1x16x16xf32> to vector<16x16xf32>
      %30 = vector.shape_cast %26 : vector<16x16xf32> to vector<1x16x16xf32>
      tpu.vector_store %arg9[%27, %c0_30, %c0_31], %30 {strides = array<i32>} : memref<8x16x16xf32, #tpu.memory_space<vmem>>, vector<1x16x16xf32>,
      %c2_i32 = arith.constant 2 : i32
      %c0_32 = arith.constant 0 : index
      %31 = arith.index_cast %c2_i32 : i32 to index
      %c0_33 = arith.constant 0 : index
      %c0_34 = arith.constant 0 : index
      %32 = vector.load %arg4[%c0_32, %31, %c0_33, %c0_34] : memref<1x8x8x8xf32, #tpu.memory_space<vmem>>, vector<1x1x8x8xf32>
      %33 = vector.shape_cast %32 : vector<1x1x8x8xf32> to vector<8x8xf32>
      %cst_35 = arith.constant dense<0.000000e+00> : vector<8x16xf32>
      %34 = tpu.matmul %33, %12, %cst_35 {dimension_numbers = #tpu.dot_dimension_numbers<[1], [0], [0], [1], [0, 0, 1, 1], [], []>} : vector<8x8xf32>, vector<8x16xf32>, vector<8x16xf32> -> vector<8x16xf32>
      %cst_36 = arith.constant dense<0.000000e+00> : vector<16x16xf32>
      %35 = tpu.matmul %11, %34, %cst_36 {dimension_numbers = #tpu.dot_dimension_numbers<[1], [0], [0], [1], [0, 0, 1, 1], [], []>} : vector<16x8xf32>, vector<8x16xf32>, vector<16x16xf32> -> vector<16x16xf32>
      %36 = arith.index_cast %c2_i32 : i32 to index
      %c0_37 = arith.constant 0 : index
      %c0_38 = arith.constant 0 : index
      %37 = vector.load %arg9[%36, %c0_37, %c0_38] : memref<8x16x16xf32, #tpu.memory_space<vmem>>, vector<1x16x16xf32>
      %38 = vector.shape_cast %37 : vector<1x16x16xf32> to vector<16x16xf32>
      %39 = vector.shape_cast %35 : vector<16x16xf32> to vector<1x16x16xf32>
      tpu.vector_store %arg9[%36, %c0_37, %c0_38], %39 {strides = array<i32>} : memref<8x16x16xf32, #tpu.memory_space<vmem>>, vector<1x16x16xf32>,
      %c3_i32 = arith.constant 3 : i32
      %c0_39 = arith.constant 0 : index
      %40 = arith.index_cast %c3_i32 : i32 to index
      %c0_40 = arith.constant 0 : index
      %c0_41 = arith.constant 0 : index
      %41 = vector.load %arg4[%c0_39, %40, %c0_40, %c0_41] : memref<1x8x8x8xf32, #tpu.memory_space<vmem>>, vector<1x1x8x8xf32>
      %42 = vector.shape_cast %41 : vector<1x1x8x8xf32> to vector<8x8xf32>
      %cst_42 = arith.constant dense<0.000000e+00> : vector<8x16xf32>
      %43 = tpu.matmul %42, %12, %cst_42 {dimension_numbers = #tpu.dot_dimension_numbers<[1], [0], [0], [1], [0, 0, 1, 1], [], []>} : vector<8x8xf32>, vector<8x16xf32>, vector<8x16xf32> -> vector<8x16xf32>
      %cst_43 = arith.constant dense<0.000000e+00> : vector<16x16xf32>
      %44 = tpu.matmul %11, %43, %cst_43 {dimension_numbers = #tpu.dot_dimension_numbers<[1], [0], [0], [1], [0, 0, 1, 1], [], []>} : vector<16x8xf32>, vector<8x16xf32>, vector<16x16xf32> -> vector<16x16xf32>
      %45 = arith.index_cast %c3_i32 : i32 to index
      %c0_44 = arith.constant 0 : index
      %c0_45 = arith.constant 0 : index
      %46 = vector.load %arg9[%45, %c0_44, %c0_45] : memref<8x16x16xf32, #tpu.memory_space<vmem>>, vector<1x16x16xf32>
      %47 = vector.shape_cast %46 : vector<1x16x16xf32> to vector<16x16xf32>
      %48 = vector.shape_cast %44 : vector<16x16xf32> to vector<1x16x16xf32>
      tpu.vector_store %arg9[%45, %c0_44, %c0_45], %48 {strides = array<i32>} : memref<8x16x16xf32, #tpu.memory_space<vmem>>, vector<1x16x16xf32>,
      %c4_i32 = arith.constant 4 : i32
      %c0_46 = arith.constant 0 : index
      %49 = arith.index_cast %c4_i32 : i32 to index
      %c0_47 = arith.constant 0 : index
      %c0_48 = arith.constant 0 : index
      %50 = vector.load %arg4[%c0_46, %49, %c0_47, %c0_48] : memref<1x8x8x8xf32, #tpu.memory_space<vmem>>, vector<1x1x8x8xf32>
      %51 = vector.shape_cast %50 : vector<1x1x8x8xf32> to vector<8x8xf32>
      %cst_49 = arith.constant dense<0.000000e+00> : vector<8x16xf32>
      %52 = tpu.matmul %51, %12, %cst_49 {dimension_numbers = #tpu.dot_dimension_numbers<[1], [0], [0], [1], [0, 0, 1, 1], [], []>} : vector<8x8xf32>, vector<8x16xf32>, vector<8x16xf32> -> vector<8x16xf32>
      %cst_50 = arith.constant dense<0.000000e+00> : vector<16x16xf32>
      %53 = tpu.matmul %11, %52, %cst_50 {dimension_numbers = #tpu.dot_dimension_numbers<[1], [0], [0], [1], [0, 0, 1, 1], [], []>} : vector<16x8xf32>, vector<8x16xf32>, vector<16x16xf32> -> vector<16x16xf32>
      %54 = arith.index_cast %c4_i32 : i32 to index
      %c0_51 = arith.constant 0 : index
      %c0_52 = arith.constant 0 : index
      %55 = vector.load %arg9[%54, %c0_51, %c0_52] : memref<8x16x16xf32, #tpu.memory_space<vmem>>, vector<1x16x16xf32>
      %56 = vector.shape_cast %55 : vector<1x16x16xf32> to vector<16x16xf32>
      %57 = vector.shape_cast %53 : vector<16x16xf32> to vector<1x16x16xf32>
      tpu.vector_store %arg9[%54, %c0_51, %c0_52], %57 {strides = array<i32>} : memref<8x16x16xf32, #tpu.memory_space<vmem>>, vector<1x16x16xf32>,
      %c5_i32 = arith.constant 5 : i32
      %c0_53 = arith.constant 0 : index
      %58 = arith.index_cast %c5_i32 : i32 to index
      %c0_54 = arith.constant 0 : index
      %c0_55 = arith.constant 0 : index
      %59 = vector.load %arg4[%c0_53, %58, %c0_54, %c0_55] : memref<1x8x8x8xf32, #tpu.memory_space<vmem>>, vector<1x1x8x8xf32>
      %60 = vector.shape_cast %59 : vector<1x1x8x8xf32> to vector<8x8xf32>
      %cst_56 = arith.constant dense<0.000000e+00> : vector<8x16xf32>
      %61 = tpu.matmul %60, %12, %cst_56 {dimension_numbers = #tpu.dot_dimension_numbers<[1], [0], [0], [1], [0, 0, 1, 1], [], []>} : vector<8x8xf32>, vector<8x16xf32>, vector<8x16xf32> -> vector<8x16xf32>
      %cst_57 = arith.constant dense<0.000000e+00> : vector<16x16xf32>
      %62 = tpu.matmul %11, %61, %cst_57 {dimension_numbers = #tpu.dot_dimension_numbers<[1], [0], [0], [1], [0, 0, 1, 1], [], []>} : vector<16x8xf32>, vector<8x16xf32>, vector<16x16xf32> -> vector<16x16xf32>
      %63 = arith.index_cast %c5_i32 : i32 to index
      %c0_58 = arith.constant 0 : index
      %c0_59 = arith.constant 0 : index
      %64 = vector.load %arg9[%63, %c0_58, %c0_59] : memref<8x16x16xf32, #tpu.memory_space<vmem>>, vector<1x16x16xf32>
      %65 = vector.shape_cast %64 : vector<1x16x16xf32> to vector<16x16xf32>
      %66 = vector.shape_cast %62 : vector<16x16xf32> to vector<1x16x16xf32>
      tpu.vector_store %arg9[%63, %c0_58, %c0_59], %66 {strides = array<i32>} : memref<8x16x16xf32, #tpu.memory_space<vmem>>, vector<1x16x16xf32>,
      %c6_i32 = arith.constant 6 : i32
      %c0_60 = arith.constant 0 : index
      %67 = arith.index_cast %c6_i32 : i32 to index
      %c0_61 = arith.constant 0 : index
      %c0_62 = arith.constant 0 : index
      %68 = vector.load %arg4[%c0_60, %67, %c0_61, %c0_62] : memref<1x8x8x8xf32, #tpu.memory_space<vmem>>, vector<1x1x8x8xf32>
      %69 = vector.shape_cast %68 : vector<1x1x8x8xf32> to vector<8x8xf32>
      %cst_63 = arith.constant dense<0.000000e+00> : vector<8x16xf32>
      %70 = tpu.matmul %69, %12, %cst_63 {dimension_numbers = #tpu.dot_dimension_numbers<[1], [0], [0], [1], [0, 0, 1, 1], [], []>} : vector<8x8xf32>, vector<8x16xf32>, vector<8x16xf32> -> vector<8x16xf32>
      %cst_64 = arith.constant dense<0.000000e+00> : vector<16x16xf32>
      %71 = tpu.matmul %11, %70, %cst_64 {dimension_numbers = #tpu.dot_dimension_numbers<[1], [0], [0], [1], [0, 0, 1, 1], [], []>} : vector<16x8xf32>, vector<8x16xf32>, vector<16x16xf32> -> vector<16x16xf32>
      %72 = arith.index_cast %c6_i32 : i32 to index
      %c0_65 = arith.constant 0 : index
      %c0_66 = arith.constant 0 : index
      %73 = vector.load %arg9[%72, %c0_65, %c0_66] : memref<8x16x16xf32, #tpu.memory_space<vmem>>, vector<1x16x16xf32>
      %74 = vector.shape_cast %73 : vector<1x16x16xf32> to vector<16x16xf32>
      %75 = vector.shape_cast %71 : vector<16x16xf32> to vector<1x16x16xf32>
      tpu.vector_store %arg9[%72, %c0_65, %c0_66], %75 {strides = array<i32>} : memref<8x16x16xf32, #tpu.memory_space<vmem>>, vector<1x16x16xf32>,
      %c7_i32 = arith.constant 7 : i32
      %c0_67 = arith.constant 0 : index
      %76 = arith.index_cast %c7_i32 : i32 to index
      %c0_68 = arith.constant 0 : index
      %c0_69 = arith.constant 0 : index
      %77 = vector.load %arg4[%c0_67, %76, %c0_68, %c0_69] : memref<1x8x8x8xf32, #tpu.memory_space<vmem>>, vector<1x1x8x8xf32>
      %78 = vector.shape_cast %77 : vector<1x1x8x8xf32> to vector<8x8xf32>
      %cst_70 = arith.constant dense<0.000000e+00> : vector<8x16xf32>
      %79 = tpu.matmul %78, %12, %cst_70 {dimension_numbers = #tpu.dot_dimension_numbers<[1], [0], [0], [1], [0, 0, 1, 1], [], []>} : vector<8x8xf32>, vector<8x16xf32>, vector<8x16xf32> -> vector<8x16xf32>
      %cst_71 = arith.constant dense<0.000000e+00> : vector<16x16xf32>
      %80 = tpu.matmul %11, %79, %cst_71 {dimension_numbers = #tpu.dot_dimension_numbers<[1], [0], [0], [1], [0, 0, 1, 1], [], []>} : vector<16x8xf32>, vector<8x16xf32>, vector<16x16xf32> -> vector<16x16xf32>
      %81 = arith.index_cast %c7_i32 : i32 to index
      %c0_72 = arith.constant 0 : index
      %c0_73 = arith.constant 0 : index
      %82 = vector.load %arg9[%81, %c0_72, %c0_73] : memref<8x16x16xf32, #tpu.memory_space<vmem>>, vector<1x16x16xf32>
      %83 = vector.shape_cast %82 : vector<1x16x16xf32> to vector<16x16xf32>
      %84 = vector.shape_cast %80 : vector<16x16xf32> to vector<1x16x16xf32>
      tpu.vector_store %arg9[%81, %c0_72, %c0_73], %84 {strides = array<i32>} : memref<8x16x16xf32, #tpu.memory_space<vmem>>, vector<1x16x16xf32>,
      %c8_i32 = arith.constant 8 : i32
    } else {
    }
    %cst = arith.constant 0.000000e+00 : f32
    %c0_i32_1 = arith.constant 0 : i32
    %c16_i32 = arith.constant 16 : i32
    %3 = arith.addi %c0_i32_1, %c16_i32 : i32
    %c1_i32 = arith.constant 1 : i32
    %4 = scf.for %arg10 = %c0_i32_1 to %3 step %c1_i32 iter_args(%arg11 = %cst) -> (f32)  : i32 {
      %c16_i32_8 = arith.constant 16 : i32
      %9 = arith.muli %arg1, %c16_i32_8 : i32
      %10 = arith.addi %9, %arg10 : i32
      %11 = arith.index_cast %10 : i32 to index
      %12 = memref.load %arg2[%11] : memref<16xi32, #tpu.memory_space<smem>>
      %c1_i32_9 = arith.constant 1 : i32
      %13 = arith.addi %12, %c1_i32_9 : i32
      %c7_i32 = arith.constant 7 : i32
      %14 = arith.minsi %13, %c7_i32 : i32
      %15 = arith.index_cast %10 : i32 to index
      %16 = memref.load %arg3[%15] : memref<16xf32, #tpu.memory_space<smem>>
      %17 = arith.index_cast %12 : i32 to index
      %c0_10 = arith.constant 0 : index
      %c0_11 = arith.constant 0 : index
      %18 = vector.load %arg9[%17, %c0_10, %c0_11] : memref<8x16x16xf32, #tpu.memory_space<vmem>>, vector<1x16x16xf32>
      %19 = vector.shape_cast %18 : vector<1x16x16xf32> to vector<16x16xf32>
      %20 = arith.index_cast %14 : i32 to index
      %c0_12 = arith.constant 0 : index
      %c0_13 = arith.constant 0 : index
      %21 = vector.load %arg9[%20, %c0_12, %c0_13] : memref<8x16x16xf32, #tpu.memory_space<vmem>>, vector<1x16x16xf32>
      %22 = vector.shape_cast %21 : vector<1x16x16xf32> to vector<16x16xf32>
      %23 = arith.subf %22, %19 : vector<16x16xf32>
      %24 = vector.broadcast %16 : f32 to vector<16x16xf32>
      %25 = arith.mulf %24, %23 : vector<16x16xf32>
      %26 = arith.addf %19, %25 : vector<16x16xf32>
      %27 = arith.truncf %26 : vector<16x16xf32> to vector<16x16xbf16>
      %c0_14 = arith.constant 0 : index
      %28 = arith.index_cast %arg10 : i32 to index
      %c0_15 = arith.constant 0 : index
      %c0_16 = arith.constant 0 : index
      %29 = vector.load %arg7[%c0_14, %28, %c0_15, %c0_16] : memref<1x16x16x16xbf16, #tpu.memory_space<vmem>>, vector<1x1x16x16xbf16>
      %30 = vector.shape_cast %29 : vector<1x1x16x16xbf16> to vector<16x16xbf16>
      %31 = vector.shape_cast %27 : vector<16x16xbf16> to vector<1x1x16x16xbf16>
      tpu.vector_store %arg7[%c0_14, %28, %c0_15, %c0_16], %31 {strides = array<i32>} : memref<1x16x16x16xbf16, #tpu.memory_space<vmem>>, vector<1x1x16x16xbf16>,
      %32 = vector.shape_cast %26 : vector<16x16xf32> to vector<1x16x16xf32>
      %cst_17 = arith.constant dense<0.000000e+00> : vector<1xf32>
      %33 = vector.multi_reduction <add>, %32, %cst_17 [1, 2] : vector<1x16x16xf32> to vector<1xf32>
      %34 = vector.shape_cast %33 : vector<1xf32> to vector<1x1x1xf32>
      %35 = vector.extract %34[0, 0, 0] : f32 from vector<1x1x1xf32>
      %36 = arith.addf %arg11, %35 : f32
      scf.yield %36 : f32
    }
    %c16_i32_2 = arith.constant 16 : i32
    %c0 = arith.constant 0 : index
    %c0_3 = arith.constant 0 : index
    %c0_4 = arith.constant 0 : index
    %5 = vector.load %arg8[%c0, %c0_3, %c0_4] : memref<1x1x1xf32, #tpu.memory_space<vmem>>, vector<1x1x1xf32>
    %6 = vector.broadcast %4 : f32 to vector<1x1x1xf32>
    %7 = arith.addf %5, %6 : vector<1x1x1xf32>
    %c0_5 = arith.constant 0 : index
    %c0_6 = arith.constant 0 : index
    %c0_7 = arith.constant 0 : index
    %8 = vector.load %arg8[%c0_5, %c0_6, %c0_7] : memref<1x1x1xf32, #tpu.memory_space<vmem>>, vector<1x1x1xf32>
    tpu.vector_store %arg8[%c0_5, %c0_6, %c0_7], %7 {strides = array<i32>} : memref<1x1x1xf32, #tpu.memory_space<vmem>>, vector<1x1x1xf32>,
    return
  }
  func.func @transform_0(%arg0: i32, %arg1: i32, %arg2: memref<16xi32, #tpu.memory_space<smem>>, %arg3: memref<16xf32, #tpu.memory_space<smem>>) -> (i32, i32, i32, i32) {
    %c0_i32 = arith.constant 0 : i32
    %c0_i32_0 = arith.constant 0 : i32
    %c0_i32_1 = arith.constant 0 : i32
    %c0_i32_2 = arith.constant 0 : i32
    return %arg0, %c0_i32, %c0_i32_0, %c0_i32_1 : i32, i32, i32, i32
  }
  func.func @transform_1(%arg0: i32, %arg1: i32, %arg2: memref<16xi32, #tpu.memory_space<smem>>, %arg3: memref<16xf32, #tpu.memory_space<smem>>) -> (i32, i32) {
    %c0_i32 = arith.constant 0 : i32
    %c0_i32_0 = arith.constant 0 : i32
    %c0_i32_1 = arith.constant 0 : i32
    return %c0_i32, %c0_i32_0 : i32, i32
  }
  func.func @transform_2(%arg0: i32, %arg1: i32, %arg2: memref<16xi32, #tpu.memory_space<smem>>, %arg3: memref<16xf32, #tpu.memory_space<smem>>) -> (i32, i32) {
    %c0_i32 = arith.constant 0 : i32
    %c0_i32_0 = arith.constant 0 : i32
    %c0_i32_1 = arith.constant 0 : i32
    return %c0_i32, %c0_i32_0 : i32, i32
  }
  func.func @transform_3(%arg0: i32, %arg1: i32, %arg2: memref<16xi32, #tpu.memory_space<smem>>, %arg3: memref<16xf32, #tpu.memory_space<smem>>) -> (i32, i32, i32, i32) {
    %c0_i32 = arith.constant 0 : i32
    %c0_i32_0 = arith.constant 0 : i32
    %c0_i32_1 = arith.constant 0 : i32
    return %arg0, %arg1, %c0_i32, %c0_i32_0 : i32, i32, i32, i32
  }
  func.func @transform_4(%arg0: i32, %arg1: i32, %arg2: memref<16xi32, #tpu.memory_space<smem>>, %arg3: memref<16xf32, #tpu.memory_space<smem>>) -> (i32, i32, i32) {
    %c0_i32 = arith.constant 0 : i32
    %c0_i32_0 = arith.constant 0 : i32
    %c0_i32_1 = arith.constant 0 : i32
    return %arg0, %c0_i32, %c0_i32_0 : i32, i32, i32
  }
}

</mosaic_0001>

<bundles_post_ra>
// kernel: tpu_custom_call.1
= control target key start
LH: loop header
LB: loop body
LE: loop exit
PB: predicated region body
PF: predicated region fallthrough
CT: control target
= control target key end

     0   :  { %s2412_s0 = inlined_call_operand.vmem [shape: s32[16], index: 0, kind: input, shape index: {}]   ;;  %s2413_s2 = inlined_call_operand.hbm [shape: f32[6,8,8,8], index: 2, kind: input, shape index: {}]   ;;  %s2414_s3 = inlined_call_operand.vmem [shape: f32[16,8], index: 3, kind: input, shape index: {}]   ;;  %s2415_s4 = inlined_call_operand.vmem [shape: f32[8,16], index: 4, kind: input, shape index: {}]   ;;  %s2416_s5 = inlined_call_operand.hbm [shape: bf16[6,16,16,16], index: 5, kind: output, shape index: {0}]   ;;  %s2417_s6 = inlined_call_operand.vmem [shape: f32[6,1,1], index: 6, kind: output, shape index: {1}]   ;;  %s2418_s1 = inlined_call_operand.vmem [shape: f32[16], index: 1, kind: input, shape index: {}]  }
   0x1   :  { %s12_s23 = sshll.u32 %s2412_s0, 4  ;;  %s16_s26 = sshll.u32 %s2418_s1, 4  ;;  %s13_s23 = int_to_ptr.vmem [resolvable:$true] %s12_s23  ;;  %s17_s26 = int_to_ptr.vmem [resolvable:$true] %s16_s26 }
   0x2   :  { %s1958_s27 = scalar_lea.vmem %s13_s23, 16  ;;  %p1963_p1 = scmp.lt.s32.totalorder %s13_s23, %s13_s23 }
   0x3   :  { %p1959_p0 = scmp.ne.s32.totalorder %s13_s23, %s1958_s27  ;;  %p1964_p2 = scmp.lt.s32.totalorder %s1958_s27, %s1958_s27 }
   0x5   :  { %p1965_p3 = por %p1964_p2, %p1963_p1 }
   0x7   :  { %p1966_p4 = pnand %p1965_p3, %p1959_p0 }
   0x9   :  { %1969 = shalt.err (!%p1966_p4)  }
   0xa   :  { %s2110_s28 = smov [#allocation4]   ;;  %s1970_s29 = scalar_lea.vmem %s17_s26, 16 }
   0xb   :  { %15 = dma.vmem_to_smem %s13_s23, 16, %s2110_s28, [#allocation3] }
   0xc   :  { %p1971_p5 = scmp.ne.s32.totalorder %s17_s26, %s1970_s29  ;;  %p1975_p6 = scmp.lt.s32.totalorder %s17_s26, %s17_s26 }
   0xd   :  { %p1976_p7 = scmp.lt.s32.totalorder %s1970_s29, %s1970_s29 }
   0xf   :  { %p1977_p8 = por %p1976_p7, %p1975_p6 }
  0x11   :  { %p1978_p9 = pnand %p1977_p8, %p1971_p5 }
  0x13   :  { %1981 = shalt.err (!%p1978_p9)  }
  0x14   :  { %s2111_s0 = smov [#allocation5]  }
  0x15   :  { %19 = dma.vmem_to_smem %s17_s26, 16, %s2111_s0, [#allocation3] }
  0x16   :  { %2068 = dma.done.wait [#allocation3], 32 }
  0x17   :  { %2069 = vsyncadd [#allocation3], 4294967264 }
  0x18   :  { %21 = sfence }
  0x19   :  { %22 = vsyncpa [#allocation7], 0 }
  0x1a   :  { %24 = vsyncpa [#allocation7 + $0x1], 0 }
  0x1b   :  { %25 = vsyncpa [#allocation8], 0 }
  0x1c   :  { %27 = vsyncpa [#allocation8 + $0x1], 0  ;;  %s2161_s1 = smov 0   ;;  %s2163_s30 = smov 0  }
  0x1d   :  { %s2165_s7 = smov 0   ;;  %s2167_s8 = smov 0  }
  0x1e   :  { %s2169_s9 = smov 0   ;;  %s2171_s10 = smov 0  }
  0x1f LB: > { %s1693_s11 = sadd.s32 4294967295, %s2100_s10   ;;  %s1694_s12 = sadd.s32 4294967294, %s2100_s10   ;;  %s2100_s10 = sphi %s2171_s10, %s33_s10   ;;  %s2096_s9 = sphi %s2169_s9, %s2429_s9   ;;  %s2092_s8 = sphi %s2167_s8, %s2428_s8   ;;  %s2088_s7 = sphi %s2165_s7, %s2427_s7   ;;  %s2084_s30 = sphi %s2163_s30, %s2426_s30   ;;  %s2080_s1 = sphi %s2161_s1, %s2425_s1  }
  0x20   : > { %s45_s13 = sadd.s32 1, %s2096_s9  ;;  %s52_s14 = sadd.s32 1, %s2088_s7 }
  0x21   : > { %p47_p10 = scmp.ge.s32.totalorder %s45_s13, 6  ;;  %p59_p11 = scmp.ne.s32.totalorder %s2088_s7, %s2084_s30 }
  0x22   : > { %p60_p12 = scmp.eq.s32.totalorder %s2100_s10, 0  ;;  %p65_p13 = scmp.ne.s32.totalorder %s2084_s30, %s2080_s1 }
  0x23   : > { %s2431_s13 = smov (%p47_p10, %s45_s13), 0  ;;  %p66_p1 = scmp.eq.s32.totalorder %s1693_s11, 0 }
  0x24   : > { %p2202_p0 = por %p60_p12, %p59_p11  ;;  %s49_s16 = ssub.s32 %s2096_s9, %s2431_s13 }
  0x25   : > { %p133_p2 = scmp.eq.s32.totalorder %s1693_s11, 5  ;;  %p50_p3 = scmp.eq.s32.totalorder %s49_s16, 0 }
  0x26   : > { %p2208_p4 = por %p66_p1, %p65_p13  ;;  %p139_p6 = scmp.eq.s32.totalorder %s1694_s12, 5 }
  0x27   : > { %p2212_p5 = por %p133_p2, %p59_p11  ;;  %p1884_p8 = scmp.lt.s32.totalorder %s2100_s10, 6 }
  0x28   : > { %s2217_s19 = scalar_select %p50_p3, %s2088_s7, %s52_s14  }
  0x29   : > { %p2219_p7 = por %p139_p6, %p65_p13  ;;  %s191_s21 = sand.u32 1, %s2088_s7  }
  0x2a   : > { %s1697_s22 = sshll.u32 %s191_s21, 6  ;;  %s1745_s23 = sshll.u32 %s2096_s9, 10 }
  0x2b   : > { %s201_s26 = scalar_lea.hbm %s2413_s2, %s1745_s23  ;;  %s195_s27 = scalar_lea.vmem [#allocation6], %s1697_s22 }
  0x2c   : > { %s202_s28 = sshll.u32 %s195_s27, 4  ;;  %p2231_p9 = pnand %p1884_p8, %p2202_p0  ;;  %s203_s28 = int_to_ptr.vmem [resolvable:$true] %s202_s28 }
  0x2d   : > { %p1700_p10 = scmp.ge.s32.totalorder %s2100_s10, 1  ;;  %s192_s0 = scalar_lea.sflag [#allocation7], %s191_s21 }
  0x2e   : > { %p1984_p11 = pneg %p2231_p9  ;;  %s1995_s11 = scalar_lea.vmem %s203_s28, 1024 }
  0x2f   : > { %p1996_p12 = scmp.ne.s32.totalorder %s203_s28, %s1995_s11  ;;  %s2112_s12 = smov [#allocation6]  }
  0x30   : > { %s2000_s14 = sshll.u32 %s2112_s12, 4  ;;  %s2001_s14 = int_to_ptr.vmem [resolvable:$false] %s2000_s14 }
  0x31   : > { %p1998_p13 = pnand %p1996_p12, %p1984_p11  ;;  %s2002_s16 = scalar_lea.vmem %s2001_s14, 2048 }
  0x32   : > { %p2003_p2 = scmp.lt.s32.totalorder %s203_s28, %s2001_s14  ;;  %p2004_p3 = scmp.lt.s32.totalorder %s2002_s16, %s1995_s11 }
  0x33   : > { %p1999_p1 = pneg %p1998_p13 }
  0x34   : > { %p2005_p6 = por %p2004_p3, %p2003_p2 }
  0x36   : > { %p2006_p0 = pnand %p2005_p6, %p1999_p1 }
  0x38   : > { %2009 = shalt.err (!%p2006_p0)
}
  0x39   : > { %s2113_s15 = smov 128   ;;  %s2114_s21 = smov 8  }
  0x3a   : > { %1879 = dma.hbm_to_vmem [thread:$0]  (!%p2231_p9), %s201_s26, 1024, %s203_s28, %s192_s0, %s2113_s15, %s2113_s15, %s2114_s21  }
  0x3b   : > { %p210_p8 = scmp.lt.s32.totalorder %s2100_s10, 7 }
  0x3d   : > { %p211_p11 = pnand %p1700_p10, %p210_p8 }
  0x3e   : > { %s2244_s22 = sand.u32 (!%p211_p11), 1, %s2084_s30  }
  0x3f   : > { %214 = sbr.rel (%p211_p11) target bundleno = 732 (0x2dc), region = 32  ;;  %s1701_s23 = sshll.u32 (!%p211_p11), %s2244_s22, 6 }
  0x40   : > { %s217_s24 = scalar_lea.sflag (!%p211_p11), [#allocation7], %s2244_s22  ;;  %s2248_s25 = scalar_lea.vmem (!%p211_p11), [#allocation6], %s1701_s23 }
  0x44   : > { %2071 = dma.done.wait (%p2208_p4), %s217_s24, 1024  }
  0x45   : > { %2073 = vsyncadd (%p2208_p4), %s217_s24, 4294966272  ;;  %s1702_s26 = sshll.u32 %s2244_s22, 7  ;;  %p249_p9 = scmp.lt.s32.totalorder %s2092_s8, 5  ;;  %v2115_v0 = vmov 0.0   ;;  %vm2116_vm0 = vmmov 0   ;;  %vm256_vm1 = vcmask 0  }
  0x46   : > { %1790 = vmatprep.subr.mxu0 %v2115_v0  ;;  %1792 = vmatprep.mubr.msk.f32.mxu0 %vm2116_vm0, %v2115_v0  ;;  %vm262_vm2 = vcmask 64512   ;;  %v260_v1 = vld [vmem:[%s2415_s4] sm:$0xff]  ;;  %v1706_v3 = vld [vmem:[%s2248_s25 + $0x8] sm:$0xff]  ;;  %v1710_v4 = vld [vmem:[%s2248_s25 + $0x10] sm:$0xff]  ;;  %vm417_vm3 = vcmask 130048   ;;  %s2331_s21 = scalar_lea.vmem [#allocation9], %s1702_s26 }
  0x47   : > { %s250_s27 = scalar_select %p249_p9, %s2092_s8, 5  ;;  %v261_v2 = vld [vmem:[%s2248_s25] sm:$0xff]  ;;  %1791 = vmatpush3.msra.mxu0 %v260_v1  ;;  %v1714_v5 = vld [vmem:[%s2248_s25 + $0x18] sm:$0xff]  ;;  %v1722_v7 = vld [vmem:[%s2248_s25 + $0x28] sm:$0xff] }
  0x48   : > { %1793 = vmatmul.mubr.msk.f32.vlgmr.msra.gmra.mxu0 %vm262_vm2, %v261_v2  ;;  %1800 = vmatprep.subr.mxu0 %v2115_v0  ;;  %v1718_v6 = vld [vmem:[%s2248_s25 + $0x20] sm:$0xff]  ;;  %v1726_v8 = vld [vmem:[%s2248_s25 + $0x30] sm:$0xff]  ;;  %v1730_v9 = vld [vmem:[%s2248_s25 + $0x38] sm:$0xff]  ;;  %s2333_s23 = smov 0.0   ;;  %s2335_s24 = smov 0  }
  0x49   : > { %s2261_s17 = scalar_lea.vmem %s2417_s6, %s250_s27  ;;  %1801 = vmatpush3.msra.mxu0 %v260_v1  ;;  %1802 = vmatprep.mubr.msk.f32.mxu0 %vm2116_vm0, %v2115_v0  ;;  %v258_v10 = vld [vmem:[%s2414_s3] sm:$0xff]  ;;  %v259_v12 = vld [vmem:[%s2414_s3 + $0x8] sm:$0xff] }
  0x4a   : > { %257 = vst.msk [vmem:[%s2261_s17] sm:$0x1] %vm256_vm1, %v2115_v0  ;;  %1810 = vmatprep.subr.mxu0 %v2115_v0  ;;  %1797 = vmatprep.mubr.msk.f32.mxu1 %vm262_vm2, %v258_v10 }
  0x4c   : > { %1803 = vmatmul.mubr.msk.f32.vlgmr.msra.gmra.mxu0 %vm262_vm2, %v1706_v3 }
  0x4d   : > { %1811 = vmatpush3.msra.mxu0 %v260_v1  ;;  %1812 = vmatprep.mubr.msk.f32.mxu0 %vm2116_vm0, %v2115_v0 }
  0x4e   : > { %1820 = vmatprep.subr.mxu0 %v2115_v0 }
  0x50   : > { %1813 = vmatmul.mubr.msk.f32.vlgmr.msra.gmra.mxu0 %vm262_vm2, %v1710_v4 }
  0x51   : > { %1821 = vmatpush3.msra.mxu0 %v260_v1  ;;  %1822 = vmatprep.mubr.msk.f32.mxu0 %vm2116_vm0, %v2115_v0 }
  0x52   : > { %1830 = vmatprep.subr.mxu0 %v2115_v0 }
  0x54   : > { %1823 = vmatmul.mubr.msk.f32.vlgmr.msra.gmra.mxu0 %vm262_vm2, %v1714_v5 }
  0x55   : > { %1831 = vmatpush3.msra.mxu0 %v260_v1  ;;  %1832 = vmatprep.mubr.msk.f32.mxu0 %vm2116_vm0, %v2115_v0 }
  0x56   : > { %1840 = vmatprep.subr.mxu0 %v2115_v0 }
  0x58   : > { %1833 = vmatmul.mubr.msk.f32.vlgmr.msra.gmra.mxu0 %vm262_vm2, %v1718_v6 }
  0x59   : > { %1841 = vmatpush3.msra.mxu0 %v260_v1  ;;  %1842 = vmatprep.mubr.msk.f32.mxu0 %vm2116_vm0, %v2115_v0 }
  0x5a   : > { %1850 = vmatprep.subr.mxu0 %v2115_v0 }
  0x5c   : > { %1843 = vmatmul.mubr.msk.f32.vlgmr.msra.gmra.mxu0 %vm262_vm2, %v1722_v7 }
  0x5d   : > { %1851 = vmatpush3.msra.mxu0 %v260_v1  ;;  %1852 = vmatprep.mubr.msk.f32.mxu0 %vm2116_vm0, %v2115_v0 }
  0x5e   : > { %1860 = vmatprep.subr.mxu0 %v2115_v0 }
  0x60   : > { %1853 = vmatmul.mubr.msk.f32.vlgmr.msra.gmra.mxu0 %vm262_vm2, %v1726_v8 }
  0x61   : > { %1861 = vmatpush3.msra.mxu0 %v260_v1  ;;  %1862 = vmatprep.mubr.msk.f32.mxu0 %vm2116_vm0, %v2115_v0 }
  0x64   : > { %1863 = vmatmul.mubr.msk.f32.vlgmr.msra.gmra.mxu0 %vm262_vm2, %v1730_v9 }
 0x108   : > { %v332_v11 = vpop.f32.mrf.mxu0 }
 0x109   : > { %1795 = vmatprep.subr.mxu1 %v332_v11 }
 0x10a   : > { %v1794_v13 = vpop.f32.mrf.mxu0  ;;  %1796 = vmatpush3.msra.mxu1 %v332_v11 }
 0x10b   : > { %1798 = vmatmul.mubr.msk.f32.vlgmr.msra.gmra.mxu1 %vm262_vm2, %v259_v12 }
 0x10c   : > { %v491_v14 = vpop.f32.mrf.mxu0  ;;  %1807 = vmatprep.mubr.msk.f32.mxu1 %vm262_vm2, %v258_v10 }
 0x10d   : > { %1805 = vmatprep.subr.mxu1 %v491_v14 }
 0x10e   : > { %v1804_v15 = vpop.f32.mrf.mxu0  ;;  %1806 = vmatpush3.msra.mxu1 %v491_v14 }
 0x10f   : > { %1808 = vmatmul.mubr.msk.f32.vlgmr.msra.gmra.mxu1 %vm262_vm2, %v259_v12 }
 0x110   : > { %v644_v16 = vpop.f32.mrf.mxu0  ;;  %1817 = vmatprep.mubr.msk.f32.mxu1 %vm262_vm2, %v258_v10 }
 0x111   : > { %1815 = vmatprep.subr.mxu1 %v644_v16 }
 0x112   : > { %v1814_v17 = vpop.f32.mrf.mxu0  ;;  %1816 = vmatpush3.msra.mxu1 %v644_v16 }
 0x113   : > { %1818 = vmatmul.mubr.msk.f32.vlgmr.msra.gmra.mxu1 %vm262_vm2, %v259_v12 }
 0x114   : > { %v797_v18 = vpop.f32.mrf.mxu0  ;;  %1827 = vmatprep.mubr.msk.f32.mxu1 %vm262_vm2, %v258_v10 }
 0x115   : > { %1825 = vmatprep.subr.mxu1 %v797_v18 }
 0x116   : > { %v1824_v19 = vpop.f32.mrf.mxu0  ;;  %1826 = vmatpush3.msra.mxu1 %v797_v18 }
 0x117   : > { %1828 = vmatmul.mubr.msk.f32.vlgmr.msra.gmra.mxu1 %vm262_vm2, %v259_v12 }
 0x118   : > { %v950_v20 = vpop.f32.mrf.mxu0  ;;  %1837 = vmatprep.mubr.msk.f32.mxu1 %vm262_vm2, %v258_v10 }
 0x119   : > { %1835 = vmatprep.subr.mxu1 %v950_v20 }
 0x11a   : > { %v1834_v21 = vpop.f32.mrf.mxu0  ;;  %1836 = vmatpush3.msra.mxu1 %v950_v20 }
 0x11b   : > { %1838 = vmatmul.mubr.msk.f32.vlgmr.msra.gmra.mxu1 %vm262_vm2, %v259_v12 }
 0x11c   : > { %v1103_v22 = vpop.f32.mrf.mxu0  ;;  %1847 = vmatprep.mubr.msk.f32.mxu1 %vm262_vm2, %v258_v10 }
 0x11d   : > { %1845 = vmatprep.subr.mxu1 %v1103_v22 }
 0x11e   : > { %v1844_v23 = vpop.f32.mrf.mxu0  ;;  %1846 = vmatpush3.msra.mxu1 %v1103_v22 }
 0x11f   : > { %1848 = vmatmul.mubr.msk.f32.vlgmr.msra.gmra.mxu1 %vm262_vm2, %v259_v12 }
 0x120   : > { %v1256_v24 = vpop.f32.mrf.mxu0  ;;  %1857 = vmatprep.mubr.msk.f32.mxu1 %vm262_vm2, %v258_v10 }
 0x121   : > { %1855 = vmatprep.subr.mxu1 %v1256_v24 }
 0x122   : > { %v1854_v25 = vpop.f32.mrf.mxu0  ;;  %1856 = vmatpush3.msra.mxu1 %v1256_v24 }
 0x123   : > { %1858 = vmatmul.mubr.msk.f32.vlgmr.msra.gmra.mxu1 %vm262_vm2, %v259_v12 }
 0x124   : > { %v1409_v26 = vpop.f32.mrf.mxu0  ;;  %1867 = vmatprep.mubr.msk.f32.mxu1 %vm262_vm2, %v258_v10 }
 0x125   : > { %1865 = vmatprep.subr.mxu1 %v1409_v26 }
 0x126   : > { %v1864_v27 = vpop.f32.mrf.mxu0  ;;  %1866 = vmatpush3.msra.mxu1 %v1409_v26 }
 0x127   : > { %1868 = vmatmul.mubr.msk.f32.vlgmr.msra.gmra.mxu1 %vm262_vm2, %v259_v12 }
 0x1cb   : > { %v1799_v28 = vpop.f32.mrf.mxu1 }
 0x1cc   : > { %419 = vst.msk [vmem:[#allocation2 + $0x8] sm:$0xff] %vm417_vm3, %v1799_v28 }
 0x1cd   : > { %v408_v29 = vpop.f32.mrf.mxu1 }
 0x1ce   : > { %418 = vst.msk [vmem:[#allocation2] sm:$0xff] %vm417_vm3, %v408_v29 }
 0x1cf   : > { %v1809_v30 = vpop.f32.mrf.mxu1 }
 0x1d0   : > { %572 = vst.msk [vmem:[#allocation2 + $0x18] sm:$0xff] %vm417_vm3, %v1809_v30 }
 0x1d1   : > { %v561_v31 = vpop.f32.mrf.mxu1 }
 0x1d2   : > { %571 = vst.msk [vmem:[#allocation2 + $0x10] sm:$0xff] %vm417_vm3, %v561_v31 }
 0x1d3   : > { %v1819_v32 = vpop.f32.mrf.mxu1 }
 0x1d4   : > { %725 = vst.msk [vmem:[#allocation2 + $0x28] sm:$0xff] %vm417_vm3, %v1819_v32 }
 0x1d5   : > { %v714_v33 = vpop.f32.mrf.mxu1 }
 0x1d6   : > { %724 = vst.msk [vmem:[#allocation2 + $0x20] sm:$0xff] %vm417_vm3, %v714_v33 }
 0x1d7   : > { %v1829_v34 = vpop.f32.mrf.mxu1 }
 0x1d8   : > { %878 = vst.msk [vmem:[#allocation2 + $0x38] sm:$0xff] %vm417_vm3, %v1829_v34 }
 0x1d9   : > { %v867_v35 = vpop.f32.mrf.mxu1 }
 0x1da   : > { %877 = vst.msk [vmem:[#allocation2 + $0x30] sm:$0xff] %vm417_vm3, %v867_v35 }
 0x1db   : > { %v1839_v36 = vpop.f32.mrf.mxu1 }
 0x1dc   : > { %1031 = vst.msk [vmem:[#allocation2 + $0x48] sm:$0xff] %vm417_vm3, %v1839_v36 }
 0x1dd   : > { %v1020_v37 = vpop.f32.mrf.mxu1 }
 0x1de   : > { %1030 = vst.msk [vmem:[#allocation2 + $0x40] sm:$0xff] %vm417_vm3, %v1020_v37 }
 0x1df   : > { %v1849_v38 = vpop.f32.mrf.mxu1 }
 0x1e0   : > { %1184 = vst.msk [vmem:[#allocation2 + $0x58] sm:$0xff] %vm417_vm3, %v1849_v38 }
 0x1e1   : > { %v1173_v39 = vpop.f32.mrf.mxu1 }
 0x1e2   : > { %1183 = vst.msk [vmem:[#allocation2 + $0x50] sm:$0xff] %vm417_vm3, %v1173_v39 }
 0x1e3   : > { %v1859_v40 = vpop.f32.mrf.mxu1 }
 0x1e4   : > { %1337 = vst.msk [vmem:[#allocation2 + $0x68] sm:$0xff] %vm417_vm3, %v1859_v40 }
 0x1e5   : > { %v1326_v41 = vpop.f32.mrf.mxu1 }
 0x1e6   : > { %1336 = vst.msk [vmem:[#allocation2 + $0x60] sm:$0xff] %vm417_vm3, %v1326_v41 }
 0x1e7   : > { %v1869_v42 = vpop.f32.mrf.mxu1 }
 0x1e8   : > { %1490 = vst.msk [vmem:[#allocation2 + $0x78] sm:$0xff] %vm417_vm3, %v1869_v42 }
 0x1e9   : > { %v1479_v43 = vpop.f32.mrf.mxu1 }
 0x1ea   : > { %1489 = vst.msk [vmem:[#allocation2 + $0x70] sm:$0xff] %vm417_vm3, %v1479_v43 }
 0x1eb LB: >> { %s1500_s25 = sld [smem:[#allocation4 + %s2108_s24]]  ;;  %s1748_s12 = sshll.u32 %s2108_s24, 3  ;;  %vm1531_vm4 = vcmask 125952   ;;  %s2108_s24 = sphi %s2335_s24, %s1496_s24   ;;  %s2104_s23 = sphi %s2333_s23, %s2424_s23  }
 0x1ec   : >> { %s1504_s27 = sld [smem:[#allocation5 + %s2108_s24]]  ;;  %s1530_s14 = scalar_lea.vmem %s2331_s21, %s1748_s12 [#allocation9] }
 0x1ed   : >> { %s1496_s24 = sadd.s32 1, %s2108_s24  }
 0x1ee   : >> { %p1493_p10 = scmp.ge.s32.totalorder %s1496_s24, 16  }
 0x1ef   : > { %v1548_v3 = vld [vmem:[%s2261_s17] sm:$0x1] (%p1493_p10) }
 0x1f1   : >> { %s1501_s28 = sadd.s32 1, %s1500_s25  ;;  %s1734_s26 = sshll.u32 %s1500_s25, 4 }
 0x1f2   : >> { %p1502_p4 = scmp.lt.s32.totalorder %s1501_s28, 7  ;;  %s1506_s29 = scalar_lea.vmem [#allocation2], %s1734_s26  ;;  %v1515_v48 = vstv %s1504_s27 }
 0x1f3   : >> { %v1507_v44 = vld [vmem:[%s1506_s29] sm:$0xff]  ;;  %v1508_v45 = vld [vmem:[%s1506_s29 + $0x8] sm:$0xff]  ;;  %s1749_s25 = sshll.u32 (%p1493_p10), %s2092_s8, 11  ;;  %s1573_s29 = sshll.u32 (%p1493_p10), %s2331_s21, 4  ;;  %s2363_s29 = int_to_ptr.vmem [resolvable:$true] %s1573_s29 }
 0x1f4   : >> { %s2433_s28 = smov (!%p1502_p4, %s1501_s28), 7  ;;  %s2360_s26 = scalar_lea.hbm (%p1493_p10), %s2416_s5, %s1749_s25 }
 0x1f5   : >> { %s1735_s0 = sshll.u32 %s2433_s28, 4  ;;  %s2010_s24 = scalar_lea.vmem (%p1493_p10), %s2363_s29, 2048 }
 0x1f6   : >> { %s1510_s11 = scalar_lea.vmem [#allocation2], %s1735_s0  ;;  %p2011_p12 = scmp.ne.s32.totalorder (%p1493_p10), %s2363_s29, %s2010_s24 }
 0x1f7   : >> { %v1511_v46 = vld [vmem:[%s1510_s11] sm:$0xff]  ;;  %v1512_v47 = vld [vmem:[%s1510_s11 + $0x8] sm:$0xff]  ;;  %s2117_s8 = smov (%p1493_p10), [#allocation9]  }
 0x1f8   : >> { %v1513_v49 = vsub.f32 %v1511_v46, %v1507_v44  ;;  %v1514_v50 = vsub.f32 %v1512_v47, %v1508_v45  ;;  %p2012_p13 = pnand (%p1493_p10), %p2011_p12, %p2212_p5  ;;  %s2014_s0 = sshll.u32 (%p1493_p10), %s2117_s8, 4  ;;  %s2015_s0 = int_to_ptr.vmem [resolvable:$false] %s2014_s0 }
 0x1f9   : > { %s2016_s11 = scalar_lea.vmem (%p1493_p10), %s2015_s0, 4096  ;;  %p2017_p2 = scmp.lt.s32.totalorder (%p1493_p10), %s2363_s29, %s2015_s0 }
 0x1fa   : >> { %v1516_v51 = vmul.f32 %v1515_v48, %v1513_v49  ;;  %v1517_v52 = vmul.f32 %v1515_v48, %v1514_v50  ;;  %p2013_p1 = pneg (%p1493_p10), %p2012_p13  ;;  %p2018_p3 = scmp.lt.s32.totalorder (%p1493_p10), %s2016_s11, %s2010_s24 }
 0x1fc   : >> { %v1518_v53 = vadd.f32 %v1516_v51, %v1507_v44  ;;  %v1519_v54 = vadd.f32 %v1517_v52, %v1508_v45  ;;  %p2019_p6 = por (%p1493_p10), %p2018_p3, %p2017_p2 }
 0x1fe   : >> { %v1746_v55 = vpack.c.bf16 %v1518_v53, %v1518_v53  ;;  %v1747_v56 = vpack.c.bf16 %v1519_v54, %v1519_v54  ;;  %v1535_v57 = vsel %vm417_vm3, %v1518_v53, 0.0  ;;  %v1536_v58 = vsel %vm417_vm3, %v1519_v54, 0.0  ;;  %p2020_p0 = pnand (%p1493_p10), %p2019_p6, %p2013_p1 }
 0x1ff   : >> { %v1537_v59 = vadd.f32 %v1536_v58, %v1535_v57 }
 0x200   : >> { %1532 = vst.msk [vmem:[%s1530_s14] sm:$0xf] %vm1531_vm4, %v1746_v55  ;;  %1533 = vst.msk [vmem:[%s1530_s14 + $0x4] sm:$0xf] %vm1531_vm4, %v1747_v56 }
 0x201   : >> { %1538 = vadd.xlane.f32.xlu0 %v1537_v59 }
 0x28a   : >> { %v1539_v60 = vpop.xlane.xlu0 %1538 }
 0x28b   : >> { %v1540_v61 = vrot.slane %v1539_v60, 4 }
 0x28d   : >> { %v1541_v62 = vadd.f32 %v1540_v61, %v1539_v60 }
 0x28f   : >> { %v1542_v63 = vrot.slane %v1541_v62, 2 }
 0x291   : >> { %v1543_v0 = vadd.f32 %v1542_v63, %v1541_v62 }
 0x293   : >> { %v1544_v1 = vrot.slane %v1543_v0, 1 }
 0x295   : >> { %v1545_v2 = vadd.f32 %v1544_v1, %v1543_v0 }
 0x297   : >> { %1870 = vpush %v1545_v2 }
 0x2c7   : > { %1495 = sbr.rel (!%p1493_p10) target bundleno = 491 (0x1eb), region = 117 }
 0x2c8   : >> { %s1871_s16 = spop %1870 }
 0x2c9   : >> { %s1547_s15 = sadd.f32 %s2104_s23, %s1871_s16  }
 0x2cb   : >> { %s2424_s23 = smov %s1547_s15  ;;  %v1549_v4 = vstv (%p1493_p10), %s1547_s15 }
 0x2cc   : > { %v1550_v5 = vadd.f32 %v1549_v4, %v1548_v3  ;;  %s1554_s23 = scalar_lea.sflag [#allocation8], %s2244_s22 }
 0x2ce   : > { %1552 = vst.msk [vmem:[%s2261_s17] sm:$0x1] %vm256_vm1, %v1550_v5 }
 0x2cf   : > { %2023 = shalt.err (!%p2020_p0)
}
 0x2d0   : > { %s2024_s17 = scalar_lea.hbm %s2360_s26, 2048  ;;  %s2028_s14 = scalar_lea.hbm %s2416_s5, 12288 }
 0x2d1   : > { %p2025_p8 = scmp.ne.s32.totalorder %s2360_s26, %s2024_s17  ;;  %p2029_p4 = scmp.lt.s32.totalorder %s2360_s26, %s2416_s5 }
 0x2d2   : > { %p2030_p10 = scmp.lt.s32.totalorder %s2028_s14, %s2024_s17 }
 0x2d3   : > { %p2026_p11 = pnand %p2025_p8, %p2212_p5 }
 0x2d4   : > { %p2031_p12 = por %p2030_p10, %p2029_p4 }
 0x2d5   : > { %p2027_p9 = pneg %p2026_p11 }
 0x2d7   : > { %p2032_p13 = pnand %p2031_p12, %p2027_p9 }
 0x2d9   : > { %2035 = shalt.err (!%p2032_p13)
}
 0x2da   : > { %s2118_s25 = smov 64   ;;  %s2119_s27 = smov 4  }
 0x2db   : > { %1874 = dma.vmem_to_hbm [thread:$0]  (%p2212_p5), %s2363_s29, 2048, %s2360_s26, %s1554_s23, %s2118_s25, %s2118_s25, %s2119_s27  }
 0x2dc PF: > { %p1885_p1 = scmp.ge.s32.totalorder %s2100_s10, 2  ;;  %s1591_s28 = sand.u32 1, %s2080_s1  }
 0x2dd   : > { %s1592_s24 = scalar_lea.sflag [#allocation8], %s1591_s28 }
 0x2de   : > { %p1881_p2 = pnand %p1885_p1, %p2219_p7 }
 0x2e0   : > { %p1882_p3 = pneg %p1881_p2 }
 0x2e2   : > { %2075 = dma.done.wait (%p1882_p3), %s1592_s24, 2048  }
 0x2e3   : > { %2077 = vsyncadd (%p1882_p3), %s1592_s24, 4294965248  ;;  %s33_s10 = sadd.s32 1, %s2100_s10   ;;  %s2425_s1 = smov %s2084_s30 }
 0x2e4   : > { %p30_p6 = scmp.ge.s32.totalorder %s33_s10, 8   ;;  %s2426_s30 = smov %s2088_s7 }
 0x2e5   : > { %s2427_s7 = smov %s2217_s19  ;;  %s2428_s8 = smov %s2096_s9 }
 0x2e6   : > { %s2429_s9 = smov %s2431_s13  ;;  %32 = sbr.rel (!%p30_p6) target bundleno = 31 (0x1f), region = 128 }
 0x2eb   :  { %1603 = vsyncpa [#allocation7], 1 }
 0x2ec   :  { %1605 = vsyncpa [#allocation7 + $0x1], 1 }
 0x2ed   :  { %1606 = vsyncpa [#allocation8], 1 }
 0x2ee   :  { %1608 = vsyncpa [#allocation8 + $0x1], 1 }

</bundles_post_ra>
